<compile_context>
chip_gen: v6e
topology: v6e:2x2x1
jax: 0.10.0
libtpu: 0.0.40
codegen_flags: <defaults>
</compile_context>

<pallas_src>
import jax
import jax.numpy as jnp
from jax import lax
from jax.experimental import pallas as pl
from jax.experimental.pallas import tpu as pltpu


def _cdiv(a: int, b: int) -> int:
    return -(-a // b)


def _tpu_info():
    """(vmem_capacity_bytes, num_tensorcores) with conservative fallbacks."""
    vmem_cap = 64 << 20          # safe for every generation (v7x has 64 MiB/TC)
    num_cores = 1
    try:
        info = pltpu.get_tpu_info()
        cap = getattr(info, "vmem_capacity_bytes", None)
        if cap:
            vmem_cap = int(cap)
        for name in ("num_cores", "core_count", "num_tensorcores",
                     "tensorcore_count"):
            v = getattr(info, name, None)
            if v:
                num_cores = max(1, min(int(v), 2))   # 2 TCs max (v7x)
                break
    except Exception:
        pass
    return vmem_cap, num_cores


def _make_l1_kernel(total_rows: int, block_rows: int, chunk_rows: int,
                    num_chunks: int, steps_per_slab: int, lanes: int):
    """Per-slab partial L1 sum over a (rows, lanes) slab.

    Grid = (num_slabs [parallel/core_parallel], steps_per_slab [arbitrary]).
    acc_ref: (1, lanes) f32 lane-aligned accumulator (VMEM scratch).
    o_ref  : (1, 1, 1) f32 partial-sum output block for this slab.
    """

    def kernel(w_ref, o_ref, acc_ref):
        s = pl.program_id(0)
        j = pl.program_id(1)

        @pl.when(j == 0)
        def _():
            acc_ref[...] = jnp.zeros_like(acc_ref)

        # Logical (unclamped) block index -> number of valid rows in this
        # block.  The index_map clamps the DMA to stay in-bounds; here we mask
        # based on the logical index so clamped / partial blocks contribute 0
        # for their invalid rows.
        logical_block = s * steps_per_slab + j
        row_start = logical_block * block_rows
        rows_valid = total_rows - row_start      # may be <=0 or > block_rows

        # Steady state: every row of the block is valid -> pure vreg-wise
        # |.| + f32 accumulate, chunked so intermediates stay tiny and fully
        # hidden under the streaming DMA.
        @pl.when(rows_valid >= block_rows)
        def _full():
            def body(c, carry):
                off = pl.multiple_of(c * chunk_rows, chunk_rows)
                x = w_ref[pl.ds(off, chunk_rows), :]
                acc_ref[...] += jnp.sum(jnp.abs(x), axis=0, keepdims=True,
                                        dtype=jnp.float32)
                return carry
            lax.fori_loop(0, num_chunks, body, 0)

        # Ragged / out-of-range block (runs at most once per call): mask rows
        # beyond the true row count before accumulating.
        @pl.when(rows_valid < block_rows)
        def _partial():
            def body(c, carry):
                off = pl.multiple_of(c * chunk_rows, chunk_rows)
                x = jnp.abs(w_ref[pl.ds(off, chunk_rows), :]).astype(jnp.float32)
                rid = lax.broadcasted_iota(jnp.int32, (chunk_rows, lanes), 0) + off
                x = jnp.where(rid < rows_valid, x, 0.0)
                acc_ref[...] += jnp.sum(x, axis=0, keepdims=True)
                return carry
            lax.fori_loop(0, num_chunks, body, 0)

        @pl.when(j == pl.num_programs(1) - 1)
        def _():
            # Single cross-lane (XLU) reduce per slab, not per step.
            o_ref[...] = jnp.sum(acc_ref[...]).reshape(1, 1, 1)

    return kernel


def _slab_abs_sum(slab: jax.Array,
                  per_buffer_bytes: int | None = None,
                  num_slabs: int | None = None) -> jax.Array:
    """sum(|slab|) for a 2-D (rows, lanes) slab with lanes % 128 == 0."""
    rows, lanes = slab.shape
    assert lanes % 128 == 0
    itemsize = jnp.dtype(slab.dtype).itemsize
    row_bytes = lanes * itemsize

    vmem_cap, num_cores = _tpu_info()
    if num_slabs is None:
        num_slabs = num_cores
    num_slabs = max(1, int(num_slabs))
    if per_buffer_bytes is None:
        # ~32 MiB/buffer on 128 MiB parts (v5e/v6e), ~16 MiB on v7x (64 MiB).
        per_buffer_bytes = max(1 << 20, min(vmem_cap // 4, 32 << 20))

    # Geometry: block_rows = num_chunks * chunk_rows (chunk feeds the VPU loop,
    # block feeds the DMA pipeline).
    if rows < 8:
        chunk_rows = rows
        num_chunks = 1
        block_rows = rows
    else:
        chunk_rows = (512 * 1024) // row_bytes          # ~<=512 KiB per chunk
        chunk_rows = max(8, min(128, (chunk_rows // 8) * 8, (rows // 8) * 8))
        budget_rows = max(chunk_rows, per_buffer_bytes // row_bytes)
        max_chunks = max(1, budget_rows // chunk_rows)
        needed_chunks = _cdiv(rows, chunk_rows)
        num_chunks = min(max_chunks, needed_chunks)
        block_rows = num_chunks * chunk_rows

    total_blocks = _cdiv(rows, block_rows)
    num_slabs = min(num_slabs, total_blocks)
    steps_per_slab = _cdiv(total_blocks, num_slabs)

    block_bytes = block_rows * row_bytes
    vmem_limit = int(min(vmem_cap, max(16 << 20, 2 * block_bytes + (8 << 20))))

    # Only CORE_PARALLEL reliably shards a grid axis across TensorCores
    # (v7x / megacore parts); on single-core chips keep it trivial.
    if num_cores > 1 and num_slabs > 1:
        dim_sems = (pltpu.CORE_PARALLEL, pltpu.ARBITRARY)
    else:
        dim_sems = ("arbitrary", "arbitrary")

    def w_index_map(s, j):
        blk = s * steps_per_slab + j
        # Clamp so the DMA never starts past the array; the kernel masks the
        # (at most one) redundant block to zero via its logical index.
        return (jnp.minimum(blk, total_blocks - 1), 0)

    kernel = _make_l1_kernel(rows, block_rows, chunk_rows, num_chunks,
                             steps_per_slab, lanes)

    partials = pl.pallas_call(
        kernel,
        out_shape=jax.ShapeDtypeStruct((num_slabs, 1, 1), jnp.float32),
        grid_spec=pltpu.PrefetchScalarGridSpec(
            num_scalar_prefetch=0,
            grid=(num_slabs, steps_per_slab),
            in_specs=[pl.BlockSpec((block_rows, lanes), w_index_map)],
            out_specs=pl.BlockSpec((1, 1, 1), lambda s, j: (s, 0, 0)),
            scratch_shapes=[pltpu.VMEM((1, lanes), jnp.float32)],
        ),
        compiler_params=pltpu.CompilerParams(
            dimension_semantics=dim_sems,
            vmem_limit_bytes=vmem_limit,
        ),
        cost_estimate=pl.CostEstimate(
            flops=2 * rows * lanes,
            transcendentals=0,
            bytes_accessed=rows * row_bytes + num_slabs * 4,
        ),
    )(slab)

    return jnp.sum(partials)


def l1_loss(weight: jax.Array,
            weight_loss: float = 1.0,
            *,
            lanes: int = 512,
            small_fallback_bytes: int = 4 << 20,
            per_buffer_bytes: int | None = None,
            num_slabs: int | None = None) -> jax.Array:
    """Pallas implementation of L1Loss.forward(classification_head_weight)."""
    w = jnp.asarray(weight)
    numel = int(w.size)
    assert numel > 0, "empty weight"
    assert lanes % 128 == 0 and lanes > 0
    itemsize = jnp.dtype(w.dtype).itemsize
    scale = jnp.float32(float(weight_loss) / (numel ** 0.5))

    def _ref_sum(x):
        return jnp.sum(jnp.abs(x.astype(jnp.float32)))

    # Small-tensor fast path: fused XLA abs+reduce beats any pallas_call.
    if numel * itemsize <= small_fallback_bytes:
        return _ref_sum(w) * scale

    if (w.ndim >= 2 and w.shape[-1] % 128 == 0
            and w.shape[-1] * itemsize <= (4 << 20)):
        # Typical classification head: stream directly, no reshape, no pad.
        slab = w if w.ndim == 2 else w.reshape(-1, w.shape[-1])
        total = _slab_abs_sum(slab, per_buffer_bytes=per_buffer_bytes,
                              num_slabs=num_slabs)
    else:
        # General shapes: flatten to a lane-dense slab; the sub-lane tail
        # (< `lanes` elements) is summed outside the kernel — no jnp.pad.
        flat = w.reshape(-1)
        main_rows = numel // lanes
        if main_rows == 0:
            return _ref_sum(w) * scale
        main_len = main_rows * lanes
        total = _slab_abs_sum(flat[:main_len].reshape(main_rows, lanes),
                              per_buffer_bytes=per_buffer_bytes,
                              num_slabs=num_slabs)
        if main_len != numel:
            total = total + _ref_sum(flat[main_len:])

    return total * scale


def l1_loss_ref(weight: jax.Array, weight_loss: float = 1.0) -> jax.Array:
    """Pure-JAX reference (mirrors the PyTorch forward exactly)."""
    sparsity = jnp.sum(jnp.abs(weight.astype(jnp.float32)))
    sparsity = sparsity / (weight.size ** 0.5)
    return jnp.float32(weight_loss) * sparsity


if __name__ == "__main__":
    key = jax.random.PRNGKey(0)
    k0, k1, k2, k3 = jax.random.split(key, 4)

    def check(name, w, wl, **kw):
        got = jax.block_until_ready(l1_loss(w, wl, **kw))
        want = jax.block_until_ready(l1_loss_ref(w, wl))
        assert jnp.allclose(got, want, rtol=2e-5, atol=2e-5), (name, got, want)

    # 1) Small classification head (16 classes, hidden=32): small-tensor fast path.
    w1 = jax.random.normal(k0, (16, 32), dtype=jnp.float32)
    check("small_fastpath", w1, 0.5)

    # 2) Same head forced through the Pallas kernel (flatten route, 1 block).
    check("small_forced", w1, 0.5, small_fallback_bytes=0)

    # 3) Lane-aligned 2-D head with ragged rows: direct streaming + in-kernel
    #    masking of the partial last block (no reshape, no pad).
    w2 = jax.random.normal(k1, (300, 256), dtype=jnp.float32)
    check("head_masked", w2, 1.25, small_fallback_bytes=0)

    # 4) bf16 head, multiple grid steps, 2 slabs, partial + clamped blocks
    #    (tiny per-buffer budget to force several pipeline steps).
    w3 = jax.random.normal(k2, (1024, 384), dtype=jnp.bfloat16)
    check("multiblock_bf16", w3, 0.75, small_fallback_bytes=0,
          per_buffer_bytes=300_000, num_slabs=2)

    # 5) 1-D ragged weight: flatten route with sub-lane tail handled outside.
    w4 = jax.random.normal(k3, (1000,), dtype=jnp.float32)
    check("flat_tail", w4, 1.0, small_fallback_bytes=0)

    print("KERNEL_OK")
</pallas_src>

<mosaic_0001>
module attributes {stable_mosaic.version = 11 : i64} {
  func.func @kernel(%arg0: i32, %arg1: i32, %arg2: memref<1x512xf32, #tpu.memory_space<vmem>>, %arg3: memref<1x1x1xf32, #tpu.memory_space<vmem>>, %arg4: memref<1x512xf32, #tpu.memory_space<vmem>>) attributes {dimension_semantics = [#tpu.dimension_semantics<arbitrary>, #tpu.dimension_semantics<arbitrary>], iteration_bounds = array<i64: 1, 1>, scalar_prefetch = 0 : i64, scratch_operands = 1 : i64, tpu.core_type = #tpu.core_type<tc>, window_params = [{transform_indices = @transform_0, window_bounds = array<i64: 1, 512>}, {transform_indices = @transform_1, window_bounds = array<i64: 1, 1, 1>}]} {
    %c0_i32 = arith.constant 0 : i32
    %0 = arith.cmpi eq, %arg1, %c0_i32 : i32
    %1 = arith.extui %0 : i1 to i32
    %c0_i32_0 = arith.constant 0 : i32
    %2 = arith.cmpi ne, %1, %c0_i32_0 : i32
    scf.if %2 {
      %cst = arith.constant 0.000000e+00 : f32
      %16 = vector.broadcast %cst : f32 to vector<1x512xf32>
      %c0 = arith.constant 0 : index
      %c0_9 = arith.constant 0 : index
      %17 = vector.load %arg4[%c0, %c0_9] : memref<1x512xf32, #tpu.memory_space<vmem>>, vector<1x512xf32>
      tpu.vector_store %arg4[%c0, %c0_9], %16 {strides = array<i32>} : memref<1x512xf32, #tpu.memory_space<vmem>>, vector<1x512xf32>,
    } else {
    }
    %c1_i32 = arith.constant 1 : i32
    %3 = arith.muli %arg0, %c1_i32 : i32
    %4 = arith.addi %3, %arg1 : i32
    %c1_i32_1 = arith.constant 1 : i32
    %5 = arith.muli %4, %c1_i32_1 : i32
    %c1_i32_2 = arith.constant 1 : i32
    %6 = arith.subi %c1_i32_2, %5 : i32
    %c1_i32_3 = arith.constant 1 : i32
    %7 = arith.cmpi sge, %6, %c1_i32_3 : i32
    %8 = arith.extui %7 : i1 to i32
    %c0_i32_4 = arith.constant 0 : i32
    %9 = arith.cmpi ne, %8, %c0_i32_4 : i32
    scf.if %9 {
      %c0_i32_9 = arith.constant 0 : i32
      %c1_i32_10 = arith.constant 1 : i32
      %16 = arith.muli %c0_i32_9, %c1_i32_10 : i32
      %17 = tpu.assume_multiple %16, 1 : i32
      %18 = arith.index_cast %17 : i32 to index
      %c0 = arith.constant 0 : index
      %19 = vector.load %arg2[%18, %c0] : memref<1x512xf32, #tpu.memory_space<vmem>>, vector<1x512xf32>
      %c0_11 = arith.constant 0 : index
      %c0_12 = arith.constant 0 : index
      %20 = vector.load %arg4[%c0_11, %c0_12] : memref<1x512xf32, #tpu.memory_space<vmem>>, vector<1x512xf32>
      %21 = math.absf %19 : vector<1x512xf32>
      %cst = arith.constant dense<0.000000e+00> : vector<512xf32>
      %22 = vector.multi_reduction <add>, %21, %cst [0] : vector<1x512xf32> to vector<512xf32>
      %23 = vector.shape_cast %22 : vector<512xf32> to vector<1x512xf32>
      %24 = arith.addf %20, %23 : vector<1x512xf32>
      %c0_13 = arith.constant 0 : index
      %c0_14 = arith.constant 0 : index
      %25 = vector.load %arg4[%c0_13, %c0_14] : memref<1x512xf32, #tpu.memory_space<vmem>>, vector<1x512xf32>
      tpu.vector_store %arg4[%c0_13, %c0_14], %24 {strides = array<i32>} : memref<1x512xf32, #tpu.memory_space<vmem>>, vector<1x512xf32>,
      %c1_i32_15 = arith.constant 1 : i32
    } else {
    }
    %c1_i32_5 = arith.constant 1 : i32
    %10 = arith.cmpi slt, %6, %c1_i32_5 : i32
    %11 = arith.extui %10 : i1 to i32
    %c0_i32_6 = arith.constant 0 : i32
    %12 = arith.cmpi ne, %11, %c0_i32_6 : i32
    scf.if %12 {
      %c0_i32_9 = arith.constant 0 : i32
      %c1_i32_10 = arith.constant 1 : i32
      %16 = arith.muli %c0_i32_9, %c1_i32_10 : i32
      %17 = tpu.assume_multiple %16, 1 : i32
      %18 = arith.index_cast %17 : i32 to index
      %c0 = arith.constant 0 : index
      %19 = vector.load %arg2[%18, %c0] : memref<1x512xf32, #tpu.memory_space<vmem>>, vector<1x512xf32>
      %20 = math.absf %19 : vector<1x512xf32>
      %21 = tpu.iota {dimensions = array<i32: 0>} : vector<1x512xi32>
      %22 = vector.broadcast %17 : i32 to vector<1x512xi32>
      %23 = arith.addi %21, %22 : vector<1x512xi32>
      %24 = vector.broadcast %6 : i32 to vector<1x512xi32>
      %25 = arith.cmpi slt, %23, %24 : vector<1x512xi32>
      %cst = arith.constant 0.000000e+00 : f32
      %26 = vector.broadcast %cst : f32 to vector<1x512xf32>
      %27 = arith.select %25, %20, %26 : vector<1x512xi1>, vector<1x512xf32>
      %c0_11 = arith.constant 0 : index
      %c0_12 = arith.constant 0 : index
      %28 = vector.load %arg4[%c0_11, %c0_12] : memref<1x512xf32, #tpu.memory_space<vmem>>, vector<1x512xf32>
      %cst_13 = arith.constant dense<0.000000e+00> : vector<512xf32>
      %29 = vector.multi_reduction <add>, %27, %cst_13 [0] : vector<1x512xf32> to vector<512xf32>
      %30 = vector.shape_cast %29 : vector<512xf32> to vector<1x512xf32>
      %31 = arith.addf %28, %30 : vector<1x512xf32>
      %c0_14 = arith.constant 0 : index
      %c0_15 = arith.constant 0 : index
      %32 = vector.load %arg4[%c0_14, %c0_15] : memref<1x512xf32, #tpu.memory_space<vmem>>, vector<1x512xf32>
      tpu.vector_store %arg4[%c0_14, %c0_15], %31 {strides = array<i32>} : memref<1x512xf32, #tpu.memory_space<vmem>>, vector<1x512xf32>,
      %c1_i32_16 = arith.constant 1 : i32
    } else {
    }
    %c0_i32_7 = arith.constant 0 : i32
    %13 = arith.cmpi eq, %arg1, %c0_i32_7 : i32
    %14 = arith.extui %13 : i1 to i32
    %c0_i32_8 = arith.constant 0 : i32
    %15 = arith.cmpi ne, %14, %c0_i32_8 : i32
    scf.if %15 {
      %c0 = arith.constant 0 : index
      %c0_9 = arith.constant 0 : index
      %16 = vector.load %arg4[%c0, %c0_9] : memref<1x512xf32, #tpu.memory_space<vmem>>, vector<1x512xf32>
      %17 = vector.shape_cast %16 : vector<1x512xf32> to vector<1x1x512xf32>
      %cst = arith.constant dense<0.000000e+00> : vector<1xf32>
      %18 = vector.multi_reduction <add>, %17, %cst [1, 2] : vector<1x1x512xf32> to vector<1xf32>
      %19 = vector.shape_cast %18 : vector<1xf32> to vector<1x1x1xf32>
      %20 = vector.extract %19[0, 0, 0] : f32 from vector<1x1x1xf32>
      %21 = vector.broadcast %20 : f32 to vector<1x1x1xf32>
      %c0_10 = arith.constant 0 : index
      %c0_11 = arith.constant 0 : index
      %c0_12 = arith.constant 0 : index
      %22 = vector.load %arg3[%c0_10, %c0_11, %c0_12] : memref<1x1x1xf32, #tpu.memory_space<vmem>>, vector<1x1x1xf32>
      tpu.vector_store %arg3[%c0_10, %c0_11, %c0_12], %21 {strides = array<i32>} : memref<1x1x1xf32, #tpu.memory_space<vmem>>, vector<1x1x1xf32>,
    } else {
    }
    return
  }
  func.func @transform_0(%arg0: i32, %arg1: i32) -> (i32, i32) {
    %c1_i32 = arith.constant 1 : i32
    %0 = arith.muli %arg0, %c1_i32 : i32
    %1 = arith.addi %0, %arg1 : i32
    %c0_i32 = arith.constant 0 : i32
    %2 = arith.minsi %1, %c0_i32 : i32
    %c0_i32_0 = arith.constant 0 : i32
    %c0_i32_1 = arith.constant 0 : i32
    return %2, %c0_i32_0 : i32, i32
  }
  func.func @transform_1(%arg0: i32, %arg1: i32) -> (i32, i32, i32) {
    %c0_i32 = arith.constant 0 : i32
    %c0_i32_0 = arith.constant 0 : i32
    %c0_i32_1 = arith.constant 0 : i32
    return %arg0, %c0_i32, %c0_i32_0 : i32, i32, i32
  }
}

</mosaic_0001>

<bundles_post_ra>
// kernel: tpu_custom_call.1
= control target key start
LH: loop header
LB: loop body
LE: loop exit
PB: predicated region body
PF: predicated region fallthrough
CT: control target
= control target key end

     0   :  { %6 = vsyncpa [#allocation4], 0  ;;  %s266_s0 = inlined_call_operand.hbm [shape: f32[1,512], index: 0, kind: input, shape index: {}]   ;;  %s267_s1 = inlined_call_operand.hbm [shape: f32[1,1,1], index: 1, kind: output, shape index: {}]  }
   0x1   :  { %7 = vsyncpa [#allocation5], 0  ;;  %s247_s6 = smov [#allocation3]  }
   0x2   :  { %s20_s7 = sshll.u32 %s247_s6, 4  ;;  %s21_s7 = int_to_ptr.vmem [resolvable:$true] %s20_s7 }
   0x3   :  { %s211_s8 = scalar_lea.vmem %s21_s7, 64  ;;  %p216_p1 = scmp.lt.s32.totalorder %s21_s7, %s21_s7 }
   0x4   :  { %p212_p0 = scmp.ne.s32.totalorder %s21_s7, %s211_s8  ;;  %p217_p2 = scmp.lt.s32.totalorder %s211_s8, %s211_s8 }
   0x6   :  { %p218_p3 = por %p217_p2, %p216_p1 }
   0x8   :  { %p219_p4 = pnand %p218_p3, %p212_p0 }
   0xa   :  { %222 = shalt.err (!%p219_p4)
}
   0xb   :  { %23 = dma.hbm_to_vmem [thread:$0]  %s266_s0, 64, %s21_s7, [#allocation4]  }
   0xc   :  { %243 = dma.done.wait [#allocation4], 64  }
   0xd   :  { %244 = vsyncadd [#allocation4], 4294967232  ;;  %v34_v0 = vlaneseq  ;;  %v248_v1 = vmov 0.0   ;;  %v47_v2 = vld [vmem:[#allocation3] sm:$0xf]  ;;  %vm161_vm1 = vcmask 1040384  }
   0xe   :  { %v49_v3 = vand.u32 2147483647, %v47_v2  ;;  %s249_s0 = smov [#allocation6]   ;;  %vm179_vm2 = vcmask 0  }
   0xf   :  { %vm36_vm0 = vcmp.lt.s32.totalorder %v34_v0, 512  ;;  %v142_v6 = vshrl.u32 %v34_v0, 7  ;;  %s187_s11 = sshll.u32 %s249_s0, 4  ;;  %s188_s11 = int_to_ptr.vmem [resolvable:$true] %s187_s11 }
  0x10   :  { %38 = vst.msk [vmem:[#allocation2] sm:$0xf] %vm36_vm0, %v248_v1  ;;  %s223_s13 = scalar_lea.vmem %s188_s11, 16  ;;  %s227_s14 = scalar_lea.vmem %s188_s11, 32 }
  0x11   :  { %v143_v7 = vsub.s32 0, %v142_v6  ;;  %v147_v8 = vsub.s32 1, %v142_v6  ;;  %v151_v9 = vsub.s32 2, %v142_v6  ;;  %v155_v10 = vsub.s32 3, %v142_v6  ;;  %p224_p5 = scmp.ne.s32.totalorder %s188_s11, %s223_s13  ;;  %p228_p6 = scmp.lt.s32.totalorder %s188_s11, %s188_s11 }
  0x12   :  { %p229_p7 = scmp.lt.s32.totalorder %s227_s14, %s223_s13 }
  0x14   :  { %p230_p8 = por %p229_p7, %p228_p6 }
  0x16   :  { %p231_p9 = pnand %p230_p8, %p224_p5 }
  0x17   :  { %v48_v4 = vld [vmem:[#allocation2] sm:$0xf] }
  0x18   :  { %v51_v5 = vadd.f32 %v49_v3, %v48_v4 }
  0x1a   :  { %56 = vst.msk [vmem:[#allocation2] sm:$0xf] %vm36_vm0, %v51_v5 }
  0x21   :  { %v139_v11 = vld [vmem:[#allocation2] sm:$0xf] }
  0x22   :  { %v144_v12 = vrot.slane %v139_v11, %v143_v7  ;;  %v148_v13 = vrot.slane %v139_v11, %v147_v8  ;;  %v152_v14 = vrot.slane %v139_v11, %v151_v9  ;;  %v156_v15 = vrot.slane %v139_v11, %v155_v10 }
  0x24   :  { %v162_v16 = vsel %vm161_vm1, %v144_v12, 0.0  ;;  %v163_v17 = vsel %vm161_vm1, %v148_v13, 0.0  ;;  %v165_v18 = vsel %vm161_vm1, %v152_v14, 0.0  ;;  %v167_v20 = vsel %vm161_vm1, %v156_v15, 0.0 }
  0x25   :  { %v164_v19 = vadd.f32 %v163_v17, %v162_v16 }
  0x27   :  { %v166_v21 = vadd.f32 %v165_v18, %v164_v19 }
  0x29   :  { %v168_v22 = vadd.f32 %v167_v20, %v166_v21 }
  0x2b   :  { %169 = vadd.xlane.f32.xlu0 %v168_v22 }
  0xb4   :  { %v170_v23 = vpop.xlane.xlu0 %169 }
  0xb5   :  { %v171_v24 = vrot.slane %v170_v23, 4 }
  0xb7   :  { %v172_v25 = vadd.f32 %v171_v24, %v170_v23 }
  0xb9   :  { %v173_v26 = vrot.slane %v172_v25, 2 }
  0xbb   :  { %v174_v27 = vadd.f32 %v173_v26, %v172_v25 }
  0xbd   :  { %v175_v28 = vrot.slane %v174_v27, 1 }
  0xbf   :  { %v176_v29 = vadd.f32 %v175_v28, %v174_v27 }
  0xc1   :  { %198 = vpush %v176_v29 }
  0xf2   :  { %s199_s12 = spop %198 }
  0xf3   :  { %v178_v30 = vstv %s199_s12 }
  0xf4   :  { %180 = vst.msk [vmem:[#allocation6] sm:$0x1] %vm179_vm2, %v178_v30 }
  0xf5   :  { %234 = shalt.err (!%p231_p9)
}
  0xf6   :  { %190 = dma.vmem_to_hbm [thread:$0]  %s188_s11, 16, %s267_s1, [#allocation5]  }
  0xf7   :  { %245 = dma.done.wait [#allocation5], 16  }
  0xf8   :  { %246 = vsyncadd [#allocation5], 4294967280 }
  0xf9   :  { %194 = vsyncpa [#allocation4], 1 }
  0xfa   :  { %195 = vsyncpa [#allocation5], 1 }

</bundles_post_ra>
